<compile_context>
chip_gen: v7x
topology: tpu7x:2x2x1
jax: 0.10.0
libtpu: 0.0.40
codegen_flags: <defaults>
</compile_context>

<pallas_src>
import jax
import jax.numpy as jnp
from jax import lax
from jax.experimental import pallas as pl
from jax.experimental.pallas import tpu as pltpu

_EPS = 1e-12  # zero-row guard (norm floor = sqrt(_EPS))


def l2_normalize_kernel(x_ref, o_ref):
    # Load the (TM, D) tile; do all normalization math in f32.
    xf = x_ref[...].astype(jnp.float32)
    # Sum of squares along the feature (lane) axis -> XLU reduce.
    sumsq = jnp.sum(xf * xf, axis=1, keepdims=True)        # (TM, 1)
    # rsqrt goes to the EUP slot; clamp so an all-zero row doesn't NaN.
    inv_norm = lax.rsqrt(jnp.maximum(sumsq, _EPS))          # (TM, 1)
    o_ref[...] = (xf * inv_norm).astype(o_ref.dtype)


def _round_down(v, m):
    return max(m, (v // m) * m)


def _round_up(v, m):
    return ((v + m - 1) // m) * m


def _vmem_budget_bytes():
    """Generation-aware scoped-VMEM budget (v7x: 64 MiB/TC, v5e/v6e: 128 MiB)."""
    try:
        cap = int(pltpu.get_tpu_info().vmem_capacity_bytes)
    except Exception:
        cap = 64 << 20  # conservative fallback sized for v7x
    # Leave headroom; never ask for more than 96 MiB.
    return min((cap * 3) // 4, 96 << 20)


def normalize_forward(x, *, tile_rows=None):
    """L2-normalize a (B, D) array along dim 1 with a tiled Pallas kernel."""
    assert x.ndim == 2, "Normalize kernel expects (B, D); flatten upstream."
    # TODO(synk): only power=2 (the module default) is implemented.
    B, D = x.shape
    itemsize = jnp.dtype(x.dtype).itemsize
    sublane = {4: 8, 2: 16, 1: 32}.get(itemsize, 8)
    row_bytes = D * itemsize
    total_bytes = B * row_bytes

    vmem_limit = _vmem_budget_bytes()
    # VMEM footprint ~ 4 * block_bytes (double-buffered input + output).
    per_block_budget = max(row_bytes, vmem_limit // 4)

    if tile_rows is not None:
        TM = max(1, min(int(tile_rows), B))
    elif total_bytes <= (2 << 20):
        # Tiny problem: one block, no per-step pipeline overhead.
        TM = B
    else:
        # Byte-budget the block (~4-8 MiB), sublane-aligned.
        target_block = min(8 << 20, per_block_budget)
        TM = _round_down(min(B, max(1, target_block // row_bytes)), sublane)
        # Keep >= 4 grid steps so the "parallel" batch axis shards rows across
        # both TensorCores on v7x (measured no-op on v5e/v6e).
        TM = min(TM, max(sublane, _round_up(pl.cdiv(B, 4), sublane)))

    # Guard: shrink TM until double-buffered in+out blocks fit the VMEM budget.
    if TM < B and 4 * TM * row_bytes > vmem_limit:
        TM = _round_down(max(sublane, vmem_limit // (4 * row_bytes)), sublane)
    # TODO(synk): if D alone is so wide that even a sublane-tall block blows
    # VMEM, a two-pass / D-chunked accumulator variant would be needed.

    grid = (pl.cdiv(B, TM),)

    # Roughly: square + reduce + scale ~ 3*B*D flops, one rsqrt per row,
    # one read + one write of the array.
    cost = pl.CostEstimate(
        flops=3 * B * D,
        transcendentals=B,
        bytes_accessed=2 * total_bytes,
    )

    return pl.pallas_call(
        l2_normalize_kernel,
        out_shape=jax.ShapeDtypeStruct((B, D), x.dtype),
        grid_spec=pltpu.PrefetchScalarGridSpec(
            num_scalar_prefetch=0,
            grid=grid,
            # Full feature dim per tile (the reduction needs all of D);
            # batch axis is tiled and pipelined.
            in_specs=[pl.BlockSpec((TM, D), lambda i: (i, 0))],
            out_specs=pl.BlockSpec((TM, D), lambda i: (i, 0)),
        ),
        compiler_params=pltpu.CompilerParams(
            dimension_semantics=("parallel",),  # megacore sharding on v7x
            vmem_limit_bytes=int(vmem_limit),
        ),
        cost_estimate=cost,
    )(x)


def reference_forward(x, power=2):
    xf = x.astype(jnp.float32)
    norm = jnp.power(jnp.sum(jnp.power(xf, power), axis=1, keepdims=True),
                     1.0 / power)
    return (xf / norm).astype(x.dtype)


if __name__ == "__main__":
    key = jax.random.PRNGKey(0)

    # Case 1: small CRD-style embedding (B=16, D=128). Auto path -> one block.
    B1, D1 = 16, 128
    x1 = jax.random.normal(key, (B1, D1), dtype=jnp.float32)
    out1 = jax.block_until_ready(normalize_forward(x1))
    ref1 = reference_forward(x1)
    assert out1.shape == (B1, D1)
    assert jnp.allclose(out1, ref1, atol=1e-5, rtol=1e-5)

    # Case 2: force the multi-step tiled path (grid of 4) to exercise the
    # pipelined streaming code on a still-small shape.
    B2, D2 = 64, 128
    x2 = jax.random.normal(jax.random.PRNGKey(1), (B2, D2), dtype=jnp.float32)
    out2 = jax.block_until_ready(normalize_forward(x2, tile_rows=16))
    ref2 = reference_forward(x2)
    assert out2.shape == (B2, D2)
    assert jnp.allclose(out2, ref2, atol=1e-5, rtol=1e-5)

    print("KERNEL_OK")
</pallas_src>

<mosaic_0001>
module attributes {stable_mosaic.version = 11 : i64} {
  func.func @l2_normalize_kernel(%arg0: i32, %arg1: memref<16x128xf32, #tpu.memory_space<vmem>>, %arg2: memref<16x128xf32, #tpu.memory_space<vmem>>) attributes {dimension_semantics = [#tpu.dimension_semantics<parallel>], iteration_bounds = array<i64: 1>, scalar_prefetch = 0 : i64, scratch_operands = 0 : i64, tpu.core_type = #tpu.core_type<tc>, window_params = [{transform_indices = @transform_0, window_bounds = array<i64: 16, 128>}, {transform_indices = @transform_1, window_bounds = array<i64: 16, 128>}]} {
    %c0 = arith.constant 0 : index
    %c0_0 = arith.constant 0 : index
    %0 = vector.load %arg1[%c0, %c0_0] : memref<16x128xf32, #tpu.memory_space<vmem>>, vector<16x128xf32>
    %1 = arith.mulf %0, %0 : vector<16x128xf32>
    %cst = arith.constant dense<0.000000e+00> : vector<16xf32>
    %2 = vector.multi_reduction <add>, %1, %cst [1] : vector<16x128xf32> to vector<16xf32>
    %3 = vector.shape_cast %2 : vector<16xf32> to vector<16x1xf32>
    %cst_1 = arith.constant 9.99999996E-13 : f32
    %4 = vector.broadcast %cst_1 : f32 to vector<16x1xf32>
    %5 = arith.maximumf %3, %4 : vector<16x1xf32>
    %6 = math.rsqrt %5 : vector<16x1xf32>
    %7 = vector.broadcast %6 : vector<16x1xf32> to vector<16x128xf32>
    %8 = arith.mulf %0, %7 : vector<16x128xf32>
    %c0_2 = arith.constant 0 : index
    %c0_3 = arith.constant 0 : index
    %9 = vector.load %arg2[%c0_2, %c0_3] : memref<16x128xf32, #tpu.memory_space<vmem>>, vector<16x128xf32>
    tpu.vector_store %arg2[%c0_2, %c0_3], %8 {strides = array<i32>} : memref<16x128xf32, #tpu.memory_space<vmem>>, vector<16x128xf32>,
    return
  }
  func.func @transform_0(%arg0: i32) -> (i32, i32) {
    %c0_i32 = arith.constant 0 : i32
    %c0_i32_0 = arith.constant 0 : i32
    return %arg0, %c0_i32 : i32, i32
  }
  func.func @transform_1(%arg0: i32) -> (i32, i32) {
    %c0_i32 = arith.constant 0 : i32
    %c0_i32_0 = arith.constant 0 : i32
    return %arg0, %c0_i32 : i32, i32
  }
}

</mosaic_0001>

<bundles_post_ra>
// kernel: tpu_custom_call.1
= control target key start
LH: loop header
LB: loop body
LE: loop exit
PB: predicated region body
PF: predicated region fallthrough
CT: control target
= control target key end

     0   :  { %6 = vsyncpa [#allocation3], 0  ;;  %s156_s0 = inlined_call_operand.hbm [shape: f32[16,128], index: 0, kind: input, shape index: {}]   ;;  %s157_s1 = inlined_call_operand.hbm [shape: f32[16,128], index: 1, kind: output, shape index: {}]  }
   0x1   :  { %7 = vsyncpa [#allocation4], 0  ;;  %s112_s6 = smov [#allocation2]   ;;  %s64_s10 = scalar_lea.hbm %s156_s0, 256 }
   0x2   :  { %s13_s7 = sshll.u32 %s112_s6, 4  ;;  %p65_p0 = scmp.ne.s32.totalorder %s156_s0, %s64_s10  ;;  %s14_s7 = int_to_ptr.vmem [resolvable:$true] %s13_s7 }
   0x3   :  { %p68_p1 = scmp.lt.u32.totalorder %s64_s10, %s156_s0 }
   0x5   :  { %p70_p2 = pnand %p68_p1, %p65_p0 }
   0x7   :  { %73 = shalt.err (!%p70_p2)
}
   0x8   :  { %s74_s15 = scalar_lea.vmem %s14_s7, 256  ;;  %p79_p4 = scmp.lt.s32.totalorder %s14_s7, %s14_s7 }
   0x9   :  { %p75_p3 = scmp.ne.s32.totalorder %s14_s7, %s74_s15  ;;  %p80_p5 = scmp.lt.s32.totalorder %s74_s15, %s74_s15 }
   0xb   :  { %p81_p6 = por %p80_p5, %p79_p4 }
   0xd   :  { %p82_p7 = pnand %p81_p6, %p75_p3 }
   0xf   :  { %85 = shalt.err (!%p82_p7)
}
  0x10   :  { %s113_s16 = smov 128   ;;  %s114_s17 = smov 8  }
  0x11   :  { %19 = dma.hbm_to_vmem [thread:$0]  %s156_s0, 256, %s14_s7, [#allocation3], %s113_s16, %s113_s16, %s114_s17  }
  0x12   :  { %108 = dma.done.wait [#allocation3], 256  }
  0x13   :  { %109 = vsyncadd [#allocation3], 4294967040  ;;  %v23_v0 = vld [vmem:[#allocation2] sm:$0xff]  ;;  %v24_v1 = vld [vmem:[#allocation2 + $0x8] sm:$0xff]  ;;  %s115_s20 = smov [#allocation5]  }
  0x14   :  { %v25_v2 = vmul.f32 %v23_v0, %v23_v0  ;;  %v26_v3 = vmul.f32 %v24_v1, %v24_v1  ;;  %s44_s21 = sshll.u32 %s115_s20, 4  ;;  %s45_s21 = int_to_ptr.vmem [resolvable:$true] %s44_s21 }
  0x15   :  { %s86_s0 = scalar_lea.vmem %s45_s21, 256  ;;  %p91_p9 = scmp.lt.s32.totalorder %s45_s21, %s45_s21 }
  0x16   :  { %27 = vadd.xlane.f32.xlu0 %v25_v2  ;;  %p87_p8 = scmp.ne.s32.totalorder %s45_s21, %s86_s0  ;;  %p92_p10 = scmp.lt.s32.totalorder %s86_s0, %s86_s0 }
  0x18   :  { %p93_p11 = por %p92_p10, %p91_p9 }
  0x1a   :  { %29 = vadd.xlane.f32.xlu0 %v26_v3  ;;  %p94_p12 = pnand %p93_p11, %p87_p8 }
  0xa3   :  { %v28_v4 = vpop.xlane.xlu0 %27 }
  0xa4   :  { %v31_v5 = vmax.f32 %v28_v4, 1e-12 }
  0xa6   :  { %60 = vrsqrt.f32 %v31_v5 }
  0xa7   :  { %v30_v6 = vpop.xlane.xlu0 %29 }
  0xa8   :  { %v32_v7 = vmax.f32 %v30_v6, 1e-12 }
  0xaa   :  { %62 = vrsqrt.f32 %v32_v7 }
  0xb0   :  { %v61_v8 = vpop.eup %60 }
  0xb1   :  { %v35_v9 = vmul.f32 %v61_v8, %v23_v0 }
  0xb3   :  { %37 = vst [vmem:[#allocation5] sm:$0xff] %v35_v9 }
  0xb4   :  { %v63_v10 = vpop.eup %62 }
  0xb5   :  { %v36_v11 = vmul.f32 %v63_v10, %v24_v1 }
  0xb7   :  { %38 = vst [vmem:[#allocation5 + $0x8] sm:$0xff] %v36_v11 }
  0xb8   :  { %97 = shalt.err (!%p94_p12)
}
  0xb9   :  { %s98_s24 = scalar_lea.hbm %s157_s1, 256 }
  0xba   :  { %p99_p13 = scmp.ne.s32.totalorder %s157_s1, %s98_s24  ;;  %p102_p0 = scmp.lt.u32.totalorder %s98_s24, %s157_s1 }
  0xbc   :  { %p104_p1 = pnand %p102_p0, %p99_p13 }
  0xbe   :  { %107 = shalt.err (!%p104_p1)
}
  0xbf   :  { %50 = dma.vmem_to_hbm [thread:$0]  %s45_s21, 256, %s157_s1, [#allocation4], %s113_s16, %s113_s16, %s114_s17  }
  0xc0   :  { %110 = dma.done.wait [#allocation4], 256  }
  0xc1   :  { %111 = vsyncadd [#allocation4], 4294967040 }
  0xc2   :  { %54 = vsyncpa [#allocation3], 1 }
  0xc3   :  { %55 = vsyncpa [#allocation4], 1 }

</bundles_post_ra>
